<compile_context>
chip_gen: v7x
topology: tpu7x:2x2x1
jax: 0.10.0
libtpu: 0.0.40
codegen_flags: <defaults>
</compile_context>

<pallas_src>
import jax
import jax.numpy as jnp
from jax.experimental import pallas as pl
from jax.experimental.pallas import tpu as pltpu


def _hardsigmoid_kernel(x_ref, o_ref):
    x = x_ref[...]
    # Compute in the input dtype (no widen-then-cast); 3 cheap VPU ops/elem.
    o_ref[...] = ((jnp.clip(x, -1.0, 1.0) + 1.0) * 0.5).astype(o_ref.dtype)


def hardsigmoid(x: jax.Array, *, target_block_bytes: int = 2 * 1024 * 1024) -> jax.Array:
    """Elementwise (hardtanh(x)+1)/2 via a Pallas TPU kernel. Any shape."""
    orig_shape = x.shape
    dtype = x.dtype
    n = x.size
    if n == 0:
        return x

    itemsize = jnp.dtype(dtype).itemsize
    LANE = 128
    # Native sublane tile per dtype: 8 (32-bit), 16 (bf16/f16), 32 (int8/fp8).
    sub_min = max(8, 32 // itemsize)

    x_flat = x.reshape(-1)

    # Rare path: pad up to a multiple of 128 lanes.
    lane_pad = (-n) % LANE
    if lane_pad:
        x_flat = jnp.pad(x_flat, (0, lane_pad))
    total = x_flat.size

    # Pick the widest lane-dense slab width that divides the (padded) size.
    W = LANE
    for cand in (4096, 2048, 1024, 512, 256):
        if total % cand == 0:
            W = cand
            break
    rows = total // W

    # Row tile for ~target_block_bytes per block, aligned to sublane packing.
    tr = (target_block_bytes // (W * itemsize)) // sub_min * sub_min
    tr = max(sub_min, tr)
    if tr >= rows:
        # Single block covering the full array (full-extent dims are always legal).
        tr = rows
        rows_p = rows
    else:
        rows_p = pl.cdiv(rows, tr) * tr

    x2d = x_flat.reshape(rows, W)
    if rows_p != rows:
        # Rare path: pad a few rows rather than shrinking blocks to tiny sizes.
        x2d = jnp.pad(x2d, ((0, rows_p - rows), (0, 0)))

    grid = (rows_p // tr,)
    block_bytes = tr * W * itemsize
    # Cover double-buffered (in + out) blocks with headroom; stays modest on v5e.
    vmem_limit = int(min(96 * 2**20, max(16 * 2**20, 6 * block_bytes)))

    out2d = pl.pallas_call(
        _hardsigmoid_kernel,
        out_shape=jax.ShapeDtypeStruct((rows_p, W), dtype),
        grid=grid,
        in_specs=[pl.BlockSpec((tr, W), lambda i: (i, 0))],
        out_specs=pl.BlockSpec((tr, W), lambda i: (i, 0)),
        compiler_params=pltpu.CompilerParams(
            dimension_semantics=("parallel",),
            vmem_limit_bytes=vmem_limit,
        ),
    )(x2d)

    out_flat = out2d.reshape(-1)
    if rows_p != rows or lane_pad:
        out_flat = out_flat[:n]
    return out_flat.reshape(orig_shape)


def hardsigmoid_ref(x: jax.Array) -> jax.Array:
    return (jnp.clip(x, -1.0, 1.0) + 1.0) / 2.0


if __name__ == "__main__":
    key = jax.random.PRNGKey(0)
    # Small NCHW-like input consistent with an elementwise activation module.
    x = jax.random.normal(key, (2, 4, 16, 16), dtype=jnp.float32) * 2.0

    y = hardsigmoid(x)
    y = jax.block_until_ready(y)

    y_ref = hardsigmoid_ref(x)
    assert y.shape == x.shape and y.dtype == x.dtype
    assert jnp.allclose(y, y_ref, atol=1e-6), "mismatch vs reference"

    print("KERNEL_OK")
</pallas_src>

<mosaic_0001>
module attributes {stable_mosaic.version = 11 : i64} {
  func.func @_hardsigmoid_kernel(%arg0: i32, %arg1: memref<1x2048xf32, #tpu.memory_space<vmem>>, %arg2: memref<1x2048xf32, #tpu.memory_space<vmem>>) attributes {dimension_semantics = [#tpu.dimension_semantics<parallel>], iteration_bounds = array<i64: 1>, scalar_prefetch = 0 : i64, scratch_operands = 0 : i64, tpu.core_type = #tpu.core_type<tc>, window_params = [{transform_indices = @transform_0, window_bounds = array<i64: 1, 2048>}, {transform_indices = @transform_1, window_bounds = array<i64: 1, 2048>}]} {
    %c0 = arith.constant 0 : index
    %c0_0 = arith.constant 0 : index
    %0 = vector.load %arg1[%c0, %c0_0] : memref<1x2048xf32, #tpu.memory_space<vmem>>, vector<1x2048xf32>
    %cst = arith.constant -1.000000e+00 : f32
    %cst_1 = arith.constant 1.000000e+00 : f32
    %1 = vector.broadcast %cst : f32 to vector<1x2048xf32>
    %2 = arith.maximumf %1, %0 : vector<1x2048xf32>
    %3 = vector.broadcast %cst_1 : f32 to vector<1x2048xf32>
    %4 = arith.minimumf %3, %2 : vector<1x2048xf32>
    %cst_2 = arith.constant 1.000000e+00 : f32
    %5 = vector.broadcast %cst_2 : f32 to vector<1x2048xf32>
    %6 = arith.addf %4, %5 : vector<1x2048xf32>
    %cst_3 = arith.constant 5.000000e-01 : f32
    %7 = vector.broadcast %cst_3 : f32 to vector<1x2048xf32>
    %8 = arith.mulf %6, %7 : vector<1x2048xf32>
    %c0_4 = arith.constant 0 : index
    %c0_5 = arith.constant 0 : index
    %9 = vector.load %arg2[%c0_4, %c0_5] : memref<1x2048xf32, #tpu.memory_space<vmem>>, vector<1x2048xf32>
    tpu.vector_store %arg2[%c0_4, %c0_5], %8 {strides = array<i32>} : memref<1x2048xf32, #tpu.memory_space<vmem>>, vector<1x2048xf32>,
    return
  }
  func.func @transform_0(%arg0: i32) -> (i32, i32) {
    %c0_i32 = arith.constant 0 : i32
    %c0_i32_0 = arith.constant 0 : i32
    return %arg0, %c0_i32 : i32, i32
  }
  func.func @transform_1(%arg0: i32) -> (i32, i32) {
    %c0_i32 = arith.constant 0 : i32
    %c0_i32_0 = arith.constant 0 : i32
    return %arg0, %c0_i32 : i32, i32
  }
}

</mosaic_0001>

<bundles_post_ra>
// kernel: tpu_custom_call.1
= control target key start
LH: loop header
LB: loop body
LE: loop exit
PB: predicated region body
PF: predicated region fallthrough
CT: control target
= control target key end

     0   :  { %6 = vsyncpa [#allocation3], 0  ;;  %s136_s0 = inlined_call_operand.hbm [shape: f32[1,2048], index: 0, kind: input, shape index: {}]   ;;  %s137_s1 = inlined_call_operand.hbm [shape: f32[1,2048], index: 1, kind: output, shape index: {}]  }
   0x1   :  { %7 = vsyncpa [#allocation4], 0  ;;  %s100_s6 = smov [#allocation2]   ;;  %s52_s10 = scalar_lea.hbm %s136_s0, 256 }
   0x2   :  { %s14_s7 = sshll.u32 %s100_s6, 4  ;;  %p53_p0 = scmp.ne.s32.totalorder %s136_s0, %s52_s10  ;;  %s15_s7 = int_to_ptr.vmem [resolvable:$true] %s14_s7 }
   0x3   :  { %p56_p1 = scmp.lt.u32.totalorder %s52_s10, %s136_s0 }
   0x5   :  { %p58_p2 = pnand %p56_p1, %p53_p0 }
   0x7   :  { %61 = shalt.err (!%p58_p2)
}
   0x8   :  { %s62_s15 = scalar_lea.vmem %s15_s7, 256  ;;  %p67_p4 = scmp.lt.s32.totalorder %s15_s7, %s15_s7 }
   0x9   :  { %p63_p3 = scmp.ne.s32.totalorder %s15_s7, %s62_s15  ;;  %p68_p5 = scmp.lt.s32.totalorder %s62_s15, %s62_s15 }
   0xb   :  { %p69_p6 = por %p68_p5, %p67_p4 }
   0xd   :  { %p70_p7 = pnand %p69_p6, %p63_p3 }
   0xf   :  { %73 = shalt.err (!%p70_p7)
}
  0x10   :  { %17 = dma.hbm_to_vmem [thread:$0]  %s136_s0, 256, %s15_s7, [#allocation3]  }
  0x11   :  { %96 = dma.done.wait [#allocation3], 256  }
  0x12   :  { %97 = vsyncadd [#allocation3], 4294967040  ;;  %v21_v0 = vld [vmem:[#allocation2] sm:$0xff]  ;;  %v22_v1 = vld [vmem:[#allocation2 + $0x8] sm:$0xff]  ;;  %s101_s18 = smov [#allocation5]  }
  0x13   :  { %v48_v2 = vclamps-f32 %v21_v0, 1.0  ;;  %v49_v3 = vclamps-f32 %v22_v1, 1.0  ;;  %s39_s19 = sshll.u32 %s101_s18, 4  ;;  %s40_s19 = int_to_ptr.vmem [resolvable:$true] %s39_s19 }
  0x14   :  { %s74_s20 = scalar_lea.vmem %s40_s19, 256  ;;  %p79_p9 = scmp.lt.s32.totalorder %s40_s19, %s40_s19 }
  0x15   :  { %v27_v4 = vadd.f32 1.0, %v48_v2  ;;  %v28_v5 = vadd.f32 1.0, %v49_v3  ;;  %p75_p8 = scmp.ne.s32.totalorder %s40_s19, %s74_s20  ;;  %p80_p10 = scmp.lt.s32.totalorder %s74_s20, %s74_s20 }
  0x17   :  { %v29_v6 = vmul.f32 0.5, %v27_v4  ;;  %v30_v7 = vmul.f32 0.5, %v28_v5  ;;  %p81_p11 = por %p80_p10, %p79_p9 }
  0x19   :  { %31 = vst [vmem:[#allocation5] sm:$0xff] %v29_v6  ;;  %32 = vst [vmem:[#allocation5 + $0x8] sm:$0xff] %v30_v7  ;;  %p82_p12 = pnand %p81_p11, %p75_p8 }
  0x1b   :  { %85 = shalt.err (!%p82_p12)
}
  0x1c   :  { %s86_s22 = scalar_lea.hbm %s137_s1, 256 }
  0x1d   :  { %p87_p13 = scmp.ne.s32.totalorder %s137_s1, %s86_s22  ;;  %p90_p0 = scmp.lt.u32.totalorder %s86_s22, %s137_s1 }
  0x1f   :  { %p92_p1 = pnand %p90_p0, %p87_p13 }
  0x21   :  { %95 = shalt.err (!%p92_p1)
}
  0x22   :  { %42 = dma.vmem_to_hbm [thread:$0]  %s40_s19, 256, %s137_s1, [#allocation4]  }
  0x23   :  { %98 = dma.done.wait [#allocation4], 256  }
  0x24   :  { %99 = vsyncadd [#allocation4], 4294967040 }
  0x25   :  { %46 = vsyncpa [#allocation3], 1 }
  0x26   :  { %47 = vsyncpa [#allocation4], 1 }

</bundles_post_ra>
